<compile_context>
chip_gen: v6e
topology: v6e:2x2x1
jax: 0.10.0
libtpu: 0.0.40
codegen_flags: <defaults>
</compile_context>

<pallas_src>
import functools
import math

import jax
import jax.numpy as jnp
from jax.experimental import pallas as pl
from jax.experimental.pallas import tpu as pltpu


def _first_conv_block_kernel(const_ref, noise_ref, nw_ref, eb_ref,
                             w_ref, wcat_ref, bcat_ref, o_ref,
                             *, scale, eps, negative_slope):
    """One channel block of the fused FirstConvBlock forward (channels on lanes).

    const_ref : (HW, tc)     const input, this channel block (channels on lanes)
    noise_ref : (HW, 1)      fixed noise buffer (spatial on sublanes)
    nw_ref    : (1, tc)      noise per-channel weight
    eb_ref    : (1, tc)      epilogue bias
    w_ref     : (B, D)       latent codes
    wcat_ref  : (D, 2*tc)    fused, pre-transposed style weight [mul-half | add-half]
    bcat_ref  : (1, 2*tc)    fused style bias, "+1" pre-folded into the mul half
    o_ref     : (B, HW, tc)  output block
    """
    f32 = jnp.float32
    tc = o_ref.shape[-1]

    # ---- Batch-independent base: const -> +noise -> +bias -> leaky_relu -> instance norm
    x = const_ref[...].astype(f32)                                     # (HW, tc)
    x = x + noise_ref[...].astype(f32) * nw_ref[...].astype(f32)
    x = x + eb_ref[...].astype(f32)
    x = jnp.maximum(x, negative_slope * x)                             # LeakyReLU(0.2)

    mean = jnp.mean(x, axis=0, keepdims=True)                          # (1, tc)
    x = x - mean
    var = jnp.mean(x * x, axis=0, keepdims=True)
    x = x * jax.lax.rsqrt(var + eps)                                   # InstanceNorm (eps inside sqrt)

    # ---- Style vectors: ONE plain (B,D)x(D,2tc) MXU pass for both halves
    style = jnp.dot(w_ref[...].astype(f32), wcat_ref[...].astype(f32),
                    preferred_element_type=f32)                        # (B, 2tc)
    style = style * scale + bcat_ref[...].astype(f32)                  # wscale + bias (+1 folded)
    s_mul = style[:, :tc]                                              # (B, tc)
    s_add = style[:, tc:]                                              # (B, tc)

    # ---- Modulation: 1 mul + 1 add per element, lane-dense store
    out = x[None, :, :] * s_mul[:, None, :] + s_add[:, None, :]        # (B, HW, tc)
    o_ref[...] = out.astype(o_ref.dtype)


def _pick_channel_block(C, B, HW, D, out_itemsize, budget_bytes=12 * 1024 * 1024):
    """Pick the channel block size tc.

    Constraints / goals:
      * lane-legal & lane-dense: tc is a multiple of 128, or tc == C (full-dim rule);
      * double-buffered working set (output + const + fused weight) stays under a ~12 MiB
        budget so the pipeline double-buffers even inside v7x's 64 MiB VMEM, while still
        letting v5e/v6e take large blocks (fewer grid steps, less per-step overhead);
      * keep >= 2 grid steps when possible so dimension_semantics=("parallel",) can shard
        across v7x's two TensorCores.
    """
    def step_bytes(tc):
        out_b = B * HW * tc * out_itemsize                    # output block
        in_b = HW * tc * 4 + D * 2 * tc * 4 + 4 * tc * 4      # const + fused weight + small vecs
        return 2 * (out_b + in_b)                             # double-buffered

    if C % 128 != 0:
        return C                                              # full channel axis (legal, tiny C case)

    cands = [t for t in range(128, C + 1, 128) if C % t == 0]
    fitting = [t for t in cands if step_bytes(t) <= budget_bytes]
    tc = max(fitting) if fitting else 128
    if tc == C and C >= 256 and (C // 2) % 128 == 0:
        tc = C // 2                                           # guarantee >= 2 grid steps (v7x)
    return tc


def first_conv_block(w, const, noise, noise_weight, ep_bias,
                     dense_weight, dense_bias, *, w_space_dim, eps=1e-8,
                     out_dtype=None):
    """Pallas implementation of FirstConvBlock.forward(w).

    w:            (B, D)           latent codes, D == w_space_dim
    const:        (1, C, R, R)     learned constant input
    noise:        (1, 1, R, R)     fixed noise buffer (randomize_noise=False path)
    noise_weight: (C,)             NoiseApplyingLayer weight
    ep_bias:      (C,)             EpilogueBlock bias
    dense_weight: (2*C, D)         nn.Linear weight of the style dense ([out, in])
    dense_bias:   (2*C,)           WScaleLayer bias of the style dense
    out_dtype:    storage dtype of the output (default: const.dtype). Pass jnp.bfloat16
                  to halve store / HBM-write traffic; math stays f32 in-kernel.
    """
    B, D = w.shape
    assert D == w_space_dim
    _, C, R, R2 = const.shape
    assert R == R2
    assert noise.shape == (1, 1, R, R)
    assert noise_weight.shape == (C,)
    assert ep_bias.shape == (C,)
    assert dense_weight.shape == (2 * C, D)
    assert dense_bias.shape == (2 * C,)
    HW = R * R
    out_dtype = const.dtype if out_dtype is None else jnp.dtype(out_dtype)

    # DenseBlock's WScaleLayer inside StyleModulationLayer: gain=1, kernel_size=1,
    # lr_multiplier=1 -> scale = 1/sqrt(D)
    scale = 1.0 / math.sqrt(w_space_dim)

    tc = _pick_channel_block(C, B, HW, D, jnp.dtype(out_dtype).itemsize)
    nblk = C // tc

    # ---- Host-side layout plumbing (one-time, no hot-path compute hoisting) ----
    # Channels-on-lanes: spatial on sublanes, channels on lanes.
    const_t = const.reshape(C, HW).T            # (HW, C)
    noise_t = noise.reshape(HW, 1)              # (HW, 1)
    nw = noise_weight.reshape(1, C)
    eb = ep_bias.reshape(1, C)

    # Fused + pre-transposed style weights: per channel block the columns are
    # [mul-half | add-half], so one (B,D)x(D,2tc) matmul (plain NN contraction,
    # no transposed-operand lowering) covers both halves.
    w_mul_t = dense_weight[:C].T                # (D, C)
    w_add_t = dense_weight[C:].T                # (D, C)
    wcat = jnp.concatenate(
        [w_mul_t.reshape(D, nblk, tc), w_add_t.reshape(D, nblk, tc)], axis=2
    ).reshape(D, nblk * 2 * tc)                 # (D, nblk*2*tc)
    bcat = jnp.concatenate(
        [(dense_bias[:C] + 1.0).reshape(nblk, tc),   # fold the "+1" of x*(style0+1)
         dense_bias[C:].reshape(nblk, tc)], axis=1
    ).reshape(1, nblk * 2 * tc)                 # (1, nblk*2*tc)

    grid = (nblk,)
    in_specs = [
        pl.BlockSpec((HW, tc), lambda i: (0, i)),       # const block (channels on lanes)
        pl.BlockSpec((HW, 1), lambda i: (0, 0)),        # fixed noise (shared across blocks)
        pl.BlockSpec((1, tc), lambda i: (0, i)),        # noise weight
        pl.BlockSpec((1, tc), lambda i: (0, i)),        # epilogue bias
        pl.BlockSpec((B, D), lambda i: (0, 0)),         # latents (shared)
        pl.BlockSpec((D, 2 * tc), lambda i: (0, i)),    # fused pre-transposed style weight
        pl.BlockSpec((1, 2 * tc), lambda i: (0, i)),    # fused style bias (+1 folded)
    ]
    out_specs = pl.BlockSpec((B, HW, tc), lambda i: (0, 0, i))

    kernel = functools.partial(_first_conv_block_kernel,
                               scale=scale, eps=eps, negative_slope=0.2)

    out_bhwc = pl.pallas_call(
        kernel,
        out_shape=jax.ShapeDtypeStruct((B, HW, C), out_dtype),
        grid=grid,
        in_specs=in_specs,
        out_specs=out_specs,
        compiler_params=pltpu.CompilerParams(
            dimension_semantics=("parallel",),      # channel blocks are independent
            vmem_limit_bytes=40 * 1024 * 1024,      # > default scoped on v5e, < v7x physical
        ),
    )(const_t, noise_t, nw, eb, w, wcat, bcat)

    # Layout plumbing back to the module's NCHW output (pure relayout, not compute).
    return out_bhwc.transpose(0, 2, 1).reshape(B, C, R, R)


def first_conv_block_ref(w, const, noise, noise_weight, ep_bias,
                         dense_weight, dense_bias, *, w_space_dim, eps=1e-8):
    """Pure-JAX reference mirroring the PyTorch module exactly."""
    B = w.shape[0]
    C = const.shape[1]
    x = jnp.tile(const, (B, 1, 1, 1))
    x = x + noise * noise_weight.reshape(1, -1, 1, 1)           # NoiseApplyingLayer
    x = x + ep_bias.reshape(1, -1, 1, 1)                        # epilogue bias
    x = jnp.where(x >= 0, x, 0.2 * x)                           # LeakyReLU(0.2)
    x = x - jnp.mean(x, axis=(2, 3), keepdims=True)             # InstanceNorm
    x = x / jnp.sqrt(jnp.mean(x ** 2, axis=(2, 3), keepdims=True) + eps)
    scale = 1.0 / math.sqrt(w_space_dim)
    style = w @ dense_weight.T                                  # Linear, no bias
    style = style * scale + dense_bias[None, :]                 # WScaleLayer
    style = style.reshape(B, 2, C, 1, 1)
    return x * (style[:, 0] + 1.0) + style[:, 1]                # StyleModulationLayer


# TODO(synk): randomize_noise=True (fresh torch.randn per forward) is not implemented;
# the default randomize_noise=False fixed-buffer path is what this kernel reproduces.

if __name__ == "__main__":
    def make_inputs(key, B, C, R, D):
        k1, k2, k3, k4, k5, k6, k7 = jax.random.split(key, 7)
        w = jax.random.normal(k1, (B, D), dtype=jnp.float32)
        const = jax.random.normal(k2, (1, C, R, R), dtype=jnp.float32)          # Parameter (init: ones)
        noise = jax.random.normal(k3, (1, 1, R, R), dtype=jnp.float32)          # fixed noise buffer
        noise_weight = jax.random.normal(k4, (C,), dtype=jnp.float32) * 0.1     # Parameter (init: zeros)
        ep_bias = jax.random.normal(k5, (C,), dtype=jnp.float32) * 0.1          # Parameter (init: zeros)
        dense_weight = jax.random.normal(k6, (2 * C, D), dtype=jnp.float32) * 0.05
        dense_bias = jax.random.normal(k7, (2 * C,), dtype=jnp.float32) * 0.1
        return w, const, noise, noise_weight, ep_bias, dense_weight, dense_bias

    key = jax.random.PRNGKey(0)
    k_a, k_b = jax.random.split(key)

    # Config A: canonical-style StyleGAN first block (small spatial, many channels).
    # Exercises the lane-dense multi-step grid path (tc = 128, 2 grid steps).
    B, C, R, D = 2, 256, 4, 128
    args_a = make_inputs(k_a, B, C, R, D)
    out_a = jax.block_until_ready(first_conv_block(*args_a, w_space_dim=D))
    ref_a = first_conv_block_ref(*args_a, w_space_dim=D)
    assert out_a.shape == (B, C, R, R)
    assert jnp.allclose(out_a, ref_a, atol=1e-4, rtol=1e-4), "mismatch vs reference (config A)"

    # bf16 store path: f32 math in-kernel, cast only at the store.
    out_bf16 = jax.block_until_ready(
        first_conv_block(*args_a, w_space_dim=D, out_dtype=jnp.bfloat16))
    assert out_bf16.dtype == jnp.bfloat16
    assert jnp.allclose(out_bf16.astype(jnp.float32), ref_a, atol=5e-2, rtol=5e-2), \
        "mismatch vs reference (bf16 store)"

    # Config B: tiny channel count -> tc == C fallback (full-dim blocks).
    B2, C2, R2, D2 = 2, 4, 16, 128
    args_b = make_inputs(k_b, B2, C2, R2, D2)
    out_b = jax.block_until_ready(first_conv_block(*args_b, w_space_dim=D2))
    ref_b = first_conv_block_ref(*args_b, w_space_dim=D2)
    assert out_b.shape == (B2, C2, R2, R2)
    assert jnp.allclose(out_b, ref_b, atol=1e-4, rtol=1e-4), "mismatch vs reference (config B)"

    print("KERNEL_OK")
</pallas_src>

<mosaic_0001>
module attributes {stable_mosaic.version = 11 : i64} {
  func.func @_first_conv_block_kernel(%arg0: i32, %arg1: memref<16x128xf32, #tpu.memory_space<vmem>>, %arg2: memref<16x1xf32, #tpu.memory_space<vmem>>, %arg3: memref<1x128xf32, #tpu.memory_space<vmem>>, %arg4: memref<1x128xf32, #tpu.memory_space<vmem>>, %arg5: memref<2x128xf32, #tpu.memory_space<vmem>>, %arg6: memref<128x256xf32, #tpu.memory_space<vmem>>, %arg7: memref<1x256xf32, #tpu.memory_space<vmem>>, %arg8: memref<2x16x128xf32, #tpu.memory_space<vmem>>) attributes {dimension_semantics = [#tpu.dimension_semantics<parallel>], iteration_bounds = array<i64: 2>, scalar_prefetch = 0 : i64, scratch_operands = 0 : i64, tpu.core_type = #tpu.core_type<tc>, window_params = [{transform_indices = @transform_0, window_bounds = array<i64: 16, 128>}, {pipeline_mode = #tpu.pipeline_mode<synchronous>, transform_indices = @transform_1, window_bounds = array<i64: 16, 1>}, {transform_indices = @transform_2, window_bounds = array<i64: 1, 128>}, {transform_indices = @transform_3, window_bounds = array<i64: 1, 128>}, {pipeline_mode = #tpu.pipeline_mode<synchronous>, transform_indices = @transform_4, window_bounds = array<i64: 2, 128>}, {transform_indices = @transform_5, window_bounds = array<i64: 128, 256>}, {transform_indices = @transform_6, window_bounds = array<i64: 1, 256>}, {transform_indices = @transform_7, window_bounds = array<i64: 2, 16, 128>}]} {
    %c0 = arith.constant 0 : index
    %c0_0 = arith.constant 0 : index
    %0 = vector.load %arg1[%c0, %c0_0] : memref<16x128xf32, #tpu.memory_space<vmem>>, vector<16x128xf32>
    %c0_1 = arith.constant 0 : index
    %c0_2 = arith.constant 0 : index
    %1 = vector.load %arg2[%c0_1, %c0_2] : memref<16x1xf32, #tpu.memory_space<vmem>>, vector<16x1xf32>
    %c0_3 = arith.constant 0 : index
    %c0_4 = arith.constant 0 : index
    %2 = vector.load %arg3[%c0_3, %c0_4] : memref<1x128xf32, #tpu.memory_space<vmem>>, vector<1x128xf32>
    %3 = vector.broadcast %1 : vector<16x1xf32> to vector<16x128xf32>
    %4 = vector.broadcast %2 : vector<1x128xf32> to vector<16x128xf32>
    %5 = arith.mulf %3, %4 : vector<16x128xf32>
    %6 = arith.addf %0, %5 : vector<16x128xf32>
    %c0_5 = arith.constant 0 : index
    %c0_6 = arith.constant 0 : index
    %7 = vector.load %arg4[%c0_5, %c0_6] : memref<1x128xf32, #tpu.memory_space<vmem>>, vector<1x128xf32>
    %8 = vector.broadcast %7 : vector<1x128xf32> to vector<16x128xf32>
    %9 = arith.addf %6, %8 : vector<16x128xf32>
    %cst = arith.constant 2.000000e-01 : f32
    %10 = vector.broadcast %cst : f32 to vector<16x128xf32>
    %11 = arith.mulf %10, %9 : vector<16x128xf32>
    %12 = arith.maximumf %9, %11 : vector<16x128xf32>
    %cst_7 = arith.constant dense<0.000000e+00> : vector<128xf32>
    %13 = vector.multi_reduction <add>, %12, %cst_7 [0] : vector<16x128xf32> to vector<128xf32>
    %14 = vector.shape_cast %13 : vector<128xf32> to vector<1x128xf32>
    %cst_8 = arith.constant 1.600000e+01 : f32
    %15 = vector.broadcast %cst_8 : f32 to vector<1x128xf32>
    %16 = arith.divf %14, %15 : vector<1x128xf32>
    %17 = vector.broadcast %16 : vector<1x128xf32> to vector<16x128xf32>
    %18 = arith.subf %12, %17 : vector<16x128xf32>
    %19 = arith.mulf %18, %18 : vector<16x128xf32>
    %cst_9 = arith.constant dense<0.000000e+00> : vector<128xf32>
    %20 = vector.multi_reduction <add>, %19, %cst_9 [0] : vector<16x128xf32> to vector<128xf32>
    %21 = vector.shape_cast %20 : vector<128xf32> to vector<1x128xf32>
    %cst_10 = arith.constant 1.600000e+01 : f32
    %22 = vector.broadcast %cst_10 : f32 to vector<1x128xf32>
    %23 = arith.divf %21, %22 : vector<1x128xf32>
    %cst_11 = arith.constant 9.99999993E-9 : f32
    %24 = vector.broadcast %cst_11 : f32 to vector<1x128xf32>
    %25 = arith.addf %23, %24 : vector<1x128xf32>
    %26 = math.rsqrt %25 : vector<1x128xf32>
    %27 = vector.broadcast %26 : vector<1x128xf32> to vector<16x128xf32>
    %28 = arith.mulf %18, %27 : vector<16x128xf32>
    %c0_12 = arith.constant 0 : index
    %c0_13 = arith.constant 0 : index
    %29 = vector.load %arg5[%c0_12, %c0_13] : memref<2x128xf32, #tpu.memory_space<vmem>>, vector<2x128xf32>
    %c0_14 = arith.constant 0 : index
    %c0_15 = arith.constant 0 : index
    %30 = vector.load %arg6[%c0_14, %c0_15] : memref<128x256xf32, #tpu.memory_space<vmem>>, vector<128x256xf32>
    %cst_16 = arith.constant dense<0.000000e+00> : vector<2x256xf32>
    %31 = tpu.matmul %29, %30, %cst_16 {dimension_numbers = #tpu.dot_dimension_numbers<[1], [0], [0], [1], [0, 0, 1, 1], [], []>} : vector<2x128xf32>, vector<128x256xf32>, vector<2x256xf32> -> vector<2x256xf32>
    %cst_17 = arith.constant 0.0883883461 : f32
    %32 = vector.broadcast %cst_17 : f32 to vector<2x256xf32>
    %33 = arith.mulf %31, %32 : vector<2x256xf32>
    %c0_18 = arith.constant 0 : index
    %c0_19 = arith.constant 0 : index
    %34 = vector.load %arg7[%c0_18, %c0_19] : memref<1x256xf32, #tpu.memory_space<vmem>>, vector<1x256xf32>
    %35 = vector.broadcast %34 : vector<1x256xf32> to vector<2x256xf32>
    %36 = arith.addf %33, %35 : vector<2x256xf32>
    %37 = vector.extract_strided_slice %36 {offsets = [0, 0], sizes = [2, 128], strides = [1, 1]} : vector<2x256xf32> to vector<2x128xf32>
    %38 = vector.extract_strided_slice %36 {offsets = [0, 128], sizes = [2, 128], strides = [1, 1]} : vector<2x256xf32> to vector<2x128xf32>
    %39 = vector.shape_cast %28 : vector<16x128xf32> to vector<1x16x128xf32>
    %40 = vector.shape_cast %37 : vector<2x128xf32> to vector<2x1x128xf32>
    %41 = vector.broadcast %39 : vector<1x16x128xf32> to vector<2x16x128xf32>
    %42 = vector.broadcast %40 : vector<2x1x128xf32> to vector<2x16x128xf32>
    %43 = arith.mulf %41, %42 : vector<2x16x128xf32>
    %44 = vector.shape_cast %38 : vector<2x128xf32> to vector<2x1x128xf32>
    %45 = vector.broadcast %44 : vector<2x1x128xf32> to vector<2x16x128xf32>
    %46 = arith.addf %43, %45 : vector<2x16x128xf32>
    %c0_20 = arith.constant 0 : index
    %c0_21 = arith.constant 0 : index
    %c0_22 = arith.constant 0 : index
    %47 = vector.load %arg8[%c0_20, %c0_21, %c0_22] : memref<2x16x128xf32, #tpu.memory_space<vmem>>, vector<2x16x128xf32>
    tpu.vector_store %arg8[%c0_20, %c0_21, %c0_22], %46 {strides = array<i32>} : memref<2x16x128xf32, #tpu.memory_space<vmem>>, vector<2x16x128xf32>,
    return
  }
  func.func @transform_0(%arg0: i32) -> (i32, i32) {
    %c0_i32 = arith.constant 0 : i32
    %c0_i32_0 = arith.constant 0 : i32
    return %c0_i32, %arg0 : i32, i32
  }
  func.func @transform_1(%arg0: i32) -> (i32, i32) {
    %c0_i32 = arith.constant 0 : i32
    %c0_i32_0 = arith.constant 0 : i32
    %c0_i32_1 = arith.constant 0 : i32
    return %c0_i32, %c0_i32_0 : i32, i32
  }
  func.func @transform_2(%arg0: i32) -> (i32, i32) {
    %c0_i32 = arith.constant 0 : i32
    %c0_i32_0 = arith.constant 0 : i32
    return %c0_i32, %arg0 : i32, i32
  }
  func.func @transform_3(%arg0: i32) -> (i32, i32) {
    %c0_i32 = arith.constant 0 : i32
    %c0_i32_0 = arith.constant 0 : i32
    return %c0_i32, %arg0 : i32, i32
  }
  func.func @transform_4(%arg0: i32) -> (i32, i32) {
    %c0_i32 = arith.constant 0 : i32
    %c0_i32_0 = arith.constant 0 : i32
    %c0_i32_1 = arith.constant 0 : i32
    return %c0_i32, %c0_i32_0 : i32, i32
  }
  func.func @transform_5(%arg0: i32) -> (i32, i32) {
    %c0_i32 = arith.constant 0 : i32
    %c0_i32_0 = arith.constant 0 : i32
    return %c0_i32, %arg0 : i32, i32
  }
  func.func @transform_6(%arg0: i32) -> (i32, i32) {
    %c0_i32 = arith.constant 0 : i32
    %c0_i32_0 = arith.constant 0 : i32
    return %c0_i32, %arg0 : i32, i32
  }
  func.func @transform_7(%arg0: i32) -> (i32, i32, i32) {
    %c0_i32 = arith.constant 0 : i32
    %c0_i32_0 = arith.constant 0 : i32
    %c0_i32_1 = arith.constant 0 : i32
    return %c0_i32, %c0_i32_0, %arg0 : i32, i32, i32
  }
}

</mosaic_0001>

<bundles_post_ra>
// kernel: tpu_custom_call.1
= control target key start
LH: loop header
LB: loop body
LE: loop exit
PB: predicated region body
PF: predicated region fallthrough
CT: control target
= control target key end

     0   :  { %s1319_s0 = inlined_call_operand.hbm [shape: f32[16,256], index: 0, kind: input, shape index: {}]   ;;  %s1320_s1 = inlined_call_operand.vmem [shape: f32[16,1], index: 1, kind: input, shape index: {}]   ;;  %s1321_s2 = inlined_call_operand.vmem [shape: f32[1,256], index: 2, kind: input, shape index: {}]   ;;  %s1322_s3 = inlined_call_operand.vmem [shape: f32[1,256], index: 3, kind: input, shape index: {}]   ;;  %s1323_s4 = inlined_call_operand.vmem [shape: f32[2,128], index: 4, kind: input, shape index: {}]   ;;  %s1324_s5 = inlined_call_operand.hbm [shape: f32[128,512], index: 5, kind: input, shape index: {}]   ;;  %s1325_s6 = inlined_call_operand.vmem [shape: f32[1,512], index: 6, kind: input, shape index: {}]   ;;  %s1326_s7 = inlined_call_operand.hbm [shape: f32[2,16,256], index: 7, kind: output, shape index: {}]  }
   0x1   :  { %1330 = sst [smem:[#allocation13_spill]] %s1319_s0 }
   0x2   :  { %12 = vsyncpa [#allocation3], 0 }
   0x3   :  { %14 = vsyncpa [#allocation3 + $0x1], 0 }
   0x4   :  { %15 = vsyncpa [#allocation6], 0 }
   0x5   :  { %17 = vsyncpa [#allocation6 + $0x1], 0 }
   0x6   :  { %18 = vsyncpa [#allocation4], 0 }
   0x7   :  { %20 = vsyncpa [#allocation4 + $0x1], 0  ;;  %s1046_s24 = smov 0   ;;  %s1048_s25 = smov 0  }
   0x8   :  { %s1050_s26 = smov 0   ;;  %s1052_s27 = smov 0  }
   0x9 LB: > { %1331 = sst [smem:[#allocation11_spill]] %s986_s26  ;;  %s1067_s28 = sadd.s32 4294967295, %s990_s27   ;;  %s990_s27 = sphi %s1052_s27, %s1349_s27   ;;  %s986_s26 = sphi %s1050_s26, %s1346_s26   ;;  %s982_s25 = sphi %s1048_s25, %s1348_s25   ;;  %s978_s24 = sphi %s1046_s24, %s1347_s24  }
   0xa   : > { %s781_s29 = sadd.s32 4294967294, %s990_s27   ;;  %s1071_s30 = sadd.s32 1, %s990_s27  }
   0xb   : > { %s33_s8 = sadd.s32 1, %s986_s26  ;;  %s30_s9 = ssub.s32 %s990_s27, %s1071_s30 }
   0xc   : > { %p40_p0 = scmp.ne.s32.totalorder %s986_s26, %s982_s25  ;;  %p31_p1 = scmp.eq.s32.totalorder %s30_s9, 0 }
   0xd   : > { %p41_p2 = scmp.eq.s32.totalorder %s990_s27, 0  ;;  %p46_p3 = scmp.ne.s32.totalorder %s982_s25, %s978_s24 }
   0xe   : > { %p47_p4 = scmp.eq.s32.totalorder %s1067_s28, 0  ;;  %p216_p7 = scmp.eq.s32.totalorder %s1067_s28, 1 }
   0xf   : > { %s1083_s10 = scalar_select %p31_p1, %s986_s26, %s33_s8  }
  0x10   : > { %p1085_p5 = por %p41_p2, %p40_p0  ;;  %p1089_p6 = por %p47_p4, %p46_p3 }
  0x11   : > { %1332 = sst [smem:[#allocation12_spill]] %s1083_s10  ;;  %p222_p8 = scmp.eq.s32.totalorder %s781_s29, 1 }
  0x12   : > { %s1334_s12 = scalar_select %p1089_p6, 1, 0 }
  0x13   : > { %p818_p10 = scmp.lt.s32.totalorder %s990_s27, 2  ;;  %p1096_p11 = por %p216_p7, %p40_p0 }
  0x14   : > { %p1100_p12 = por %p222_p8, %p46_p3  ;;  %s1105_s15 = sand.u32 1, %s986_s26  }
  0x15   : > { %s1335_s13 = scalar_select %p1096_p11, 1, 0 }
  0x16   : > { %s1336_s14 = scalar_select %p1100_p12, 1, 0 }
  0x17   : > { %s785_s16 = sshll.u32 %s990_s27, 7  ;;  %s784_s17 = sshll.u32 %s1105_s15, 4 }
  0x18   : > { %s1337_s0 = sld [smem:[#allocation13_spill]]  ;;  %s252_s21 = scalar_lea.vmem [#allocation2], %s784_s17 }
  0x19   : > { %s258_s22 = sshll.u32 %s252_s21, 4  ;;  %p1116_p13 = pnand %p818_p10, %p1085_p5  ;;  %s1120_s22 = int_to_ptr.vmem [resolvable:$true] %s258_s22 }
  0x1a   : > { %s249_s29 = scalar_lea.sflag [#allocation3], %s1105_s15 }
  0x1b   : > { %p868_p2 = pneg %p1116_p13 }
  0x1e   : > { %s1112_s20 = scalar_lea.hbm %s1337_s0, %s785_s16  ;;  %s871_s16 = scalar_lea.hbm %s1337_s0, 512 }
  0x1f   : > { %s866_s8 = scalar_lea.hbm %s1112_s20, 256  ;;  %p872_p5 = scmp.lt.s32.totalorder %s1112_s20, %s1337_s0 }
  0x20   : > { %p867_p1 = scmp.ne.s32.totalorder %s1112_s20, %s866_s8  ;;  %p873_p7 = scmp.lt.s32.totalorder %s871_s16, %s866_s8 }
  0x22   : > { %p869_p3 = pnand %p868_p2, %p867_p1  ;;  %p874_p8 = por %p873_p7, %p872_p5 }
  0x24   : > { %p870_p4 = pneg %p869_p3 }
  0x26   : > { %p875_p10 = pnand %p874_p8, %p870_p4 }
  0x28   : > { %878 = shalt.err (!%p875_p10)
}
  0x29   : > { %s879_s19 = scalar_lea.vmem %s1120_s22, 256  ;;  %s992_s21 = smov [#allocation2]  }
  0x2a   : > { %p880_p9 = scmp.ne.s32.totalorder %s1120_s22, %s879_s19  ;;  %s884_s9 = sshll.u32 %s992_s21, 4  ;;  %s885_s9 = int_to_ptr.vmem [resolvable:$false] %s884_s9 }
  0x2b   : > { %s886_s11 = scalar_lea.vmem %s885_s9, 512  ;;  %p887_p0 = scmp.lt.s32.totalorder %s1120_s22, %s885_s9 }
  0x2c   : > { %p882_p1 = pnand %p880_p9, %p868_p2  ;;  %p888_p12 = scmp.lt.s32.totalorder %s886_s11, %s879_s19 }
  0x2e   : > { %p883_p3 = pneg %p882_p1  ;;  %p889_p11 = por %p888_p12, %p887_p0 }
  0x30   : > { %p890_p5 = pnand %p889_p11, %p883_p3 }
  0x32   : > { %893 = shalt.err (!%p890_p5)
}
  0x33   : > { %s993_s8 = smov 256   ;;  %s994_s16 = smov 128  }
  0x34   : > { %s995_s17 = smov 8   ;;  %p307_p9 = scmp.lt.s32.totalorder %s990_s27, 3 }
  0x35   : > { %810 = dma.hbm_to_vmem [thread:$0]  (!%p1116_p13), %s1112_s20, 256, %s1120_s22, %s249_s29, %s993_s8, %s994_s16, %s995_s17  }
  0x36   : > { %s786_s18 = sshll.u32 %s1105_s15, 8  ;;  %s800_s19 = sshll.u32 %s990_s27, 8 }
  0x37   : > { %p1339_p11 = scmp.ge.s32.totalorder %s990_s27, 1  ;;  %s1163_s0 = scalar_lea.hbm %s1324_s5, %s800_s19 }
  0x38   : > { %s284_s10 = scalar_lea.vmem [#allocation5], %s786_s18  ;;  %s281_s20 = scalar_lea.sflag [#allocation6], %s1105_s15 }
  0x39   : > { %p1156_p12 = pnand %p1339_p11, %p307_p9  ;;  %s291_s26 = sshll.u32 %s284_s10, 4  ;;  %s1165_s26 = int_to_ptr.vmem [resolvable:$true] %s291_s26 }
  0x3a   : > { %s894_s22 = scalar_lea.hbm %s1163_s0, 4096  ;;  %s899_s17 = scalar_lea.hbm %s1324_s5, 8192 }
  0x3b   : > { %p895_p0 = scmp.ne.s32.totalorder %s1163_s0, %s894_s22  ;;  %p900_p8 = scmp.lt.s32.totalorder %s1163_s0, %s1324_s5 }
  0x3c   : > { %p901_p10 = scmp.lt.s32.totalorder %s899_s17, %s894_s22 }
  0x3d   : > { %p897_p4 = pnand %p895_p0, %p868_p2 }
  0x3e   : > { %p902_p1 = por %p901_p10, %p900_p8 }
  0x3f   : > { %p898_p7 = pneg %p897_p4 }
  0x41   : > { %p903_p3 = pnand %p902_p1, %p898_p7 }
  0x43   : > { %906 = shalt.err (!%p903_p3)
}
  0x44   : > { %s907_s10 = scalar_lea.vmem %s1165_s26, 4096  ;;  %s996_s18 = smov [#allocation5]  }
  0x45   : > { %p908_p5 = scmp.ne.s32.totalorder %s1165_s26, %s907_s10  ;;  %s912_s11 = sshll.u32 %s996_s18, 4  ;;  %s913_s11 = int_to_ptr.vmem [resolvable:$false] %s912_s11 }
  0x46   : > { %s914_s29 = scalar_lea.vmem %s913_s11, 8192  ;;  %p915_p0 = scmp.lt.s32.totalorder %s1165_s26, %s913_s11 }
  0x47   : > { %p910_p9 = pnand %p908_p5, %p868_p2  ;;  %p916_p4 = scmp.lt.s32.totalorder %s914_s29, %s907_s10 }
  0x49   : > { %p911_p11 = pneg %p910_p9  ;;  %p917_p6 = por %p916_p4, %p915_p0 }
  0x4b   : > { %p918_p8 = pnand %p917_p6, %p911_p11 }
  0x4d   : > { %921 = shalt.err (!%p918_p8)
}
  0x4e   : > { %s997_s22 = smov 512   ;;  %s998_s16 = smov 16  }
  0x4f   : > { %813 = dma.hbm_to_vmem [thread:$0]  (!%p1116_p13), %s1163_s0, 4096, %s1165_s26, %s281_s20, %s997_s22, %s993_s8, %s998_s16  }
  0x50   : > { %311 = sbr.rel (%p1156_p12) target bundleno = 347 (0x15b), region = 48  ;;  %s1196_s17 = sand.u32 (!%p1156_p12), 1, %s982_s25  }
  0x51   : > { %s790_s19 = sshll.u32 (!%p1156_p12), %s1196_s17, 4  ;;  %s314_s9 = scalar_lea.sflag (!%p1156_p12), [#allocation3], %s1196_s17 }
  0x52   : > { %s1200_s10 = scalar_lea.vmem (!%p1156_p12), [#allocation2], %s790_s19  ;;  %p1341_p6 = scmp.ne.s32.totalorder (!%p1156_p12), %s1334_s12, 0 }
  0x55   : > { %965 = dma.done.wait (%p1341_p6), %s314_s9, 256  }
  0x56   : > { %967 = vsyncadd (%p1341_p6), %s314_s9, 4294967040  ;;  %s791_s0 = sshll.u32 %s1196_s17, 8  ;;  %s323_s26 = scalar_lea.sflag [#allocation6], %s1196_s17 }
  0x57   : > { %s1208_s15 = scalar_lea.vmem [#allocation5], %s791_s0 }
  0x58   : > { %969 = dma.done.wait (%p1341_p6), %s323_s26, 4096  }
  0x59   : > { %971 = vsyncadd (%p1341_p6), %s323_s26, 4294963200  ;;  %v999_v0 = vmov 0   ;;  %v1000_v1 = vmov 0.0   ;;  %v479_v2 = vld [vmem:[%s1208_s15 + $0xf8] sm:$0xff]  ;;  %v386_v3 = vld [vmem:[%s1320_s1] sm:$0xff]  ;;  %p372_p13 = scmp.lt.s32.totalorder %s1067_s28, 1 }
  0x5a   : > { %863 = vset.pattern.permute.xlu0 %v999_v0  ;;  %544 = vmatprep.mubr.f32.mxu0 %v1000_v1  ;;  %v478_v4 = vld [vmem:[%s1208_s15 + $0xf0] sm:$0xff]  ;;  %v477_v5 = vld [vmem:[%s1208_s15 + $0xe8] sm:$0xff]  ;;  %v476_v6 = vld [vmem:[%s1208_s15 + $0xe0] sm:$0xff]  ;;  %s792_s8 = sshll.u32 %s1196_s17, 5  ;;  %s797_s20 = sshll.u32 %s1067_s28, 7 }
  0x5b   : > { %480 = vmatprep.subr.mxu0 %v479_v2  ;;  %391 = vperm.xlu0 %863, %v386_v3   ;;  %v475_v7 = vld [vmem:[%s1208_s15 + $0xd8] sm:$0xff]  ;;  %v387_v8 = vld [vmem:[%s1320_s1 + $0x8] sm:$0xff]  ;;  %v474_v9 = vld [vmem:[%s1208_s15 + $0xd0] sm:$0xff]  ;;  %s373_s11 = scalar_select %p372_p13, %s1067_s28, 1 }
  0x5c   : > { %481 = vmatpush1.msra.mxu0 %v478_v4  ;;  %v473_v10 = vld [vmem:[%s1208_s15 + $0xc8] sm:$0xff]  ;;  %v472_v11 = vld [vmem:[%s1208_s15 + $0xc0] sm:$0xff]  ;;  %v471_v12 = vld [vmem:[%s1208_s15 + $0xb8] sm:$0xff]  ;;  %s371_s12 = scalar_lea.vmem [#allocation7], %s792_s8  ;;  %s1276_s29 = scalar_lea.hbm %s1326_s7, %s797_s20 }
  0x5d   : > { %482 = vmatprep.subr.mxu0 %v477_v5  ;;  %v470_v13 = vld [vmem:[%s1208_s15 + $0xb0] sm:$0xff]  ;;  %v469_v14 = vld [vmem:[%s1208_s15 + $0xa8] sm:$0xff]  ;;  %v468_v15 = vld [vmem:[%s1208_s15 + $0xa0] sm:$0xff]  ;;  %s374_s16 = scalar_lea.vmem %s1321_s2, %s373_s11  ;;  %s377_s0 = scalar_lea.vmem %s1322_s3, %s373_s11 }
  0x5e   : > { %483 = vmatpush1.msra.mxu0 %v476_v6  ;;  %v467_v16 = vld [vmem:[%s1208_s15 + $0x98] sm:$0xff]  ;;  %v466_v17 = vld [vmem:[%s1208_s15 + $0x90] sm:$0xff]  ;;  %v465_v18 = vld [vmem:[%s1208_s15 + $0x88] sm:$0xff]  ;;  %s658_s21 = sshll.u32 %s371_s12, 4  ;;  %p1342_p7 = scmp.ne.s32.totalorder %s1335_s13, 0  ;;  %s1271_s21 = int_to_ptr.vmem [resolvable:$true] %s658_s21 }
  0x5f   : > { %484 = vmatprep.subr.mxu0 %v475_v7  ;;  %396 = vperm.xlu0 %863, %v387_v8   ;;  %v464_v19 = vld [vmem:[%s1208_s15 + $0x80] sm:$0xff]  ;;  %v463_v20 = vld [vmem:[%s1208_s15 + $0x78] sm:$0xff]  ;;  %v462_v21 = vld [vmem:[%s1208_s15 + $0x70] sm:$0xff]  ;;  %s922_s22 = scalar_lea.vmem %s1271_s21, 512 }
  0x60   : > { %485 = vmatpush1.msra.mxu0 %v474_v9  ;;  %v461_v22 = vld [vmem:[%s1208_s15 + $0x68] sm:$0xff]  ;;  %v460_v23 = vld [vmem:[%s1208_s15 + $0x60] sm:$0xff]  ;;  %v459_v24 = vld [vmem:[%s1208_s15 + $0x58] sm:$0xff]  ;;  %v555_v9 = vlaneseq  ;;  %p923_p12 = scmp.ne.s32.totalorder %s1271_s21, %s922_s22 }
  0x61   : > { %486 = vmatprep.subr.mxu0 %v473_v10  ;;  %v458_v25 = vld [vmem:[%s1208_s15 + $0x50] sm:$0xff]  ;;  %v457_v26 = vld [vmem:[%s1208_s15 + $0x48] sm:$0xff]  ;;  %v456_v27 = vld [vmem:[%s1208_s15 + $0x40] sm:$0xff] }
  0x62   : > { %487 = vmatpush1.msra.mxu0 %v472_v11  ;;  %v455_v28 = vld [vmem:[%s1208_s15 + $0x38] sm:$0xff]  ;;  %v454_v29 = vld [vmem:[%s1208_s15 + $0x30] sm:$0xff]  ;;  %v453_v30 = vld [vmem:[%s1208_s15 + $0x28] sm:$0xff]  ;;  %v556_v11 = vshrl.u32 %v555_v9, 7  ;;  %p924_p10 = pnand %p923_p12, %p1342_p7 }
  0x63   : > { %488 = vmatprep.subr.mxu0 %v471_v12  ;;  %v452_v31 = vld [vmem:[%s1208_s15 + $0x20] sm:$0xff]  ;;  %v451_v32 = vld [vmem:[%s1208_s15 + $0x18] sm:$0xff]  ;;  %v450_v33 = vld [vmem:[%s1208_s15 + $0x10] sm:$0xff]  ;;  %v1001_v12 = vmov 1966171168  }
  0x64   : > { %489 = vmatpush1.msra.mxu0 %v470_v13  ;;  %v449_v34 = vld [vmem:[%s1208_s15 + $0x8] sm:$0xff]  ;;  %v448_v35 = vld [vmem:[%s1208_s15] sm:$0xff]  ;;  %v569_v13 = vunpack.c.l.s4 %v1001_v12  ;;  %p925_p1 = pneg %p924_p10 }
  0x65   : > { %490 = vmatprep.subr.mxu0 %v469_v14  ;;  %v447_v36 = vld [vmem:[%s1323_s4] sm:$0x3]  ;;  %v385_v44 = vld [vmem:[%s1200_s10 + $0x8] sm:$0xff]  ;;  %v557_v14 = vsub.s32 0, %v556_v11 }
  0x66   : > { %491 = vmatpush1.msra.mxu0 %v468_v15  ;;  %v794_v37 = vld [vmem:[%s374_s16] ss:$0 sm:$0xff]  ;;  %s1002_s16 = smov [#allocation7]  }
  0x67   : > { %492 = vmatprep.subr.mxu0 %v467_v16  ;;  %v384_v39 = vld [vmem:[%s1200_s10] sm:$0xff]  ;;  %s793_s10 = sshll.u32 %s1067_s28, 1  ;;  %v570_v16 = vunpack.c.0.s8 %v569_v13  ;;  %s646_s28 = scalar_lea.sflag [#allocation4], %s1196_s17 }
  0x68   : > { %493 = vmatpush1.msra.mxu0 %v466_v17  ;;  %v795_v41 = vld [vmem:[%s377_s0] ss:$0 sm:$0xff]  ;;  %p380_p2 = scmp.lt.s32.totalorder %s793_s10, 3  ;;  %v561_v17 = vsub.s32 1, %v556_v11  ;;  %s926_s19 = sshll.u32 %s1002_s16, 4  ;;  %s927_s19 = int_to_ptr.vmem [resolvable:$false] %s926_s19 }
  0x69   : > { %494 = vmatprep.subr.mxu0 %v465_v18  ;;  %s928_s9 = scalar_lea.vmem %s927_s19, 1024  ;;  %p929_p3 = scmp.lt.s32.totalorder %s1271_s21, %s927_s19 }
  0x6a   : > { %495 = vmatpush1.msra.mxu0 %v464_v19  ;;  %s1351_s10 = smov (!%p380_p2, %s793_s10), 3  ;;  %p930_p5 = scmp.lt.s32.totalorder %s928_s9, %s922_s22 }
  0x6b   : > { %496 = vmatprep.subr.mxu0 %v463_v20  ;;  %s382_s23 = scalar_lea.vmem %s1325_s6, %s1351_s10 }
  0x6c   : > { %497 = vmatpush1.msra.mxu0 %v462_v21  ;;  %v553_v15 = vld [vmem:[%s382_s23] sm:$0x3]  ;;  %v573_v21 = vsub.s32 %v570_v16, %v556_v11  ;;  %p931_p9 = por %p930_p5, %p929_p3 }
  0x6d   : > { %498 = vmatprep.subr.mxu0 %v461_v22  ;;  %v558_v18 = vrot.slane %v553_v15, %v557_v14  ;;  %v562_v22 = vrot.slane %v553_v15, %v561_v17 }
  0x6e   : > { %499 = vmatpush1.msra.mxu0 %v460_v23  ;;  %p932_p11 = pnand %p931_p9, %p925_p1 }
  0x6f   : > { %500 = vmatprep.subr.mxu0 %v459_v24 }
  0x70   : > { %501 = vmatpush1.msra.mxu0 %v458_v25 }
  0x71   : > { %502 = vmatprep.subr.mxu0 %v457_v26 }
  0x72   : > { %503 = vmatpush1.msra.mxu0 %v456_v27 }
  0x73   : > { %504 = vmatprep.subr.mxu0 %v455_v28 }
  0x74   : > { %505 = vmatpush1.msra.mxu0 %v454_v29 }
  0x75   : > { %506 = vmatprep.subr.mxu0 %v453_v30 }
  0x76   : > { %507 = vmatpush1.msra.mxu0 %v452_v31 }
  0x77   : > { %508 = vmatprep.subr.mxu0 %v451_v32 }
  0x78   : > { %509 = vmatpush1.msra.mxu0 %v450_v33 }
  0x79   : > { %510 = vmatprep.subr.mxu0 %v449_v34 }
  0x7a   : > { %511 = vmatpush1.msra.mxu0 %v448_v35 }
  0x7b   : > { %545 = vmatmul.mubr.f32.vlgmr.msra.gmra.mxu0 %v447_v36 }
  0xd6   : > { %v392_v38 = vpop.permute.xlu0 %391 }
  0xd7   : > { %v405_v40 = vmul.f32 %v794_v37, %v392_v38 }
  0xd9   : > { %v407_v42 = vadd.f32 %v405_v40, %v384_v39 }
  0xda   : > { %v397_v43 = vpop.permute.xlu0 %396 }
  0xdb   : > { %v416_v45 = vadd.f32 %v795_v41, %v407_v42  ;;  %v406_v46 = vmul.f32 %v794_v37, %v397_v43 }
  0xdd   : > { %v408_v47 = vadd.f32 %v406_v46, %v385_v44  ;;  %v418_v48 = vmul.f32 0.2, %v416_v45 }
  0xdf   : > { %v417_v49 = vadd.f32 %v795_v41, %v408_v47  ;;  %v420_v51 = vmax.f32 %v416_v45, %v418_v48 }
  0xe1   : > { %v419_v50 = vmul.f32 0.2, %v417_v49 }
  0xe3   : > { %v421_v52 = vmax.f32 %v417_v49, %v419_v50 }
  0xe5   : > { %v422_v53 = vadd.f32 %v421_v52, %v420_v51 }
  0xe7   : > { %v423_v54 = vrot.slane %v422_v53, 4 }
  0xe9   : > { %v424_v55 = vadd.f32 %v423_v54, %v422_v53 }
  0xeb   : > { %v425_v56 = vrot.slane %v424_v55, 2 }
  0xed   : > { %v426_v57 = vadd.f32 %v425_v56, %v424_v55 }
  0xef   : > { %v427_v58 = vrot.slane %v426_v57, 1 }
  0xf1   : > { %v428_v59 = vadd.f32 %v427_v58, %v426_v57 }
  0xf3   : > { %v430_v60 = vmul.f32 0.0625, %v428_v59 }
  0xf5   : > { %v431_v61 = vsub.f32 %v420_v51, %v430_v60  ;;  %v432_v62 = vsub.f32 %v421_v52, %v430_v60 }
  0xf7   : > { %v433_v63 = vmul.f32 %v431_v61, %v431_v61  ;;  %v434_v0 = vmul.f32 %v432_v62, %v432_v62 }
  0xf9   : > { %v435_v1 = vadd.f32 %v434_v0, %v433_v63 }
  0xfb   : > { %v436_v2 = vrot.slane %v435_v1, 4 }
  0xfd   : > { %v437_v3 = vadd.f32 %v436_v2, %v435_v1 }
  0xff   : > { %v438_v4 = vrot.slane %v437_v3, 2 }
 0x101   : > { %v439_v5 = vadd.f32 %v438_v4, %v437_v3 }
 0x103   : > { %v440_v6 = vrot.slane %v439_v5, 1 }
 0x105   : > { %v441_v7 = vadd.f32 %v440_v6, %v439_v5 }
 0x107   : > { %v442_v8 = vmul.f32 0.0625, %v441_v7 }
 0x109   : > { %v443_v10 = vadd.f32 1e-08, %v442_v8 }
 0x10b   : > { %864 = vrsqrt.f32 %v443_v10 }
 0x118   : > { %v865_v26 = vpop.eup %864 }
 0x119   : > { %v446_v32 = vmul.f32 %v865_v26, %v432_v62  ;;  %v445_v33 = vmul.f32 %v865_v26, %v431_v61 }
 0x13b   : > { %v546_v19 = vpop.f32.mrf.mxu0 }
 0x13c   : > { %v551_v20 = vmul.f32 0.088388346, %v546_v19 }
 0x13d   : > { %v548_v23 = vpop.f32.mrf.mxu0 }
 0x13e   : > { %v565_v24 = vadd.f32 %v558_v18, %v551_v20  ;;  %v552_v25 = vmul.f32 0.088388346, %v548_v23 }
 0x140   : > { %v574_v27 = vrot.slane %v565_v24, %v573_v21  ;;  %v566_v28 = vadd.f32 %v562_v22, %v552_v25 }
 0x142   : > { %v575_v29 = vcombine.high %v574_v27, %v574_v27  ;;  %v582_v30 = vrot.slane %v574_v27, %v573_v21  ;;  %v611_v31 = vrot.slane %v566_v28, %v573_v21 }
 0x144   : > { %v589_v34 = vrot.slane %v575_v29, %v573_v21  ;;  %v593_v35 = vrot.slane %v582_v30, %v557_v14  ;;  %v612_v36 = vcombine.high %v611_v31, %v611_v31  ;;  %v619_v37 = vrot.slane %v611_v31, %v573_v21 }
 0x146   : > { %v597_v38 = vrot.slane %v589_v34, %v557_v14  ;;  %v600_v39 = vmul.f32 %v593_v35, %v445_v33  ;;  %v601_v40 = vmul.f32 %v593_v35, %v446_v32  ;;  %v626_v41 = vrot.slane %v612_v36, %v573_v21 }
 0x147   : > { %v630_v42 = vrot.slane %v619_v37, %v557_v14 }
 0x148   : > { %v602_v43 = vmul.f32 %v597_v38, %v445_v33  ;;  %v603_v44 = vmul.f32 %v597_v38, %v446_v32  ;;  %v634_v45 = vrot.slane %v626_v41, %v557_v14 }
 0x149   : > { %v637_v46 = vadd.f32 %v630_v42, %v600_v39  ;;  %v638_v47 = vadd.f32 %v630_v42, %v601_v40 }
 0x14a   : > { %v639_v48 = vadd.f32 %v634_v45, %v602_v43  ;;  %v640_v49 = vadd.f32 %v634_v45, %v603_v44 }
 0x14b   : > { %641 = vst [vmem:[%s371_s12] sm:$0xff] %v637_v46  ;;  %642 = vst [vmem:[%s371_s12 + $0x8] sm:$0xff] %v638_v47 }
 0x14c   : > { %643 = vst [vmem:[%s371_s12 + $0x10] sm:$0xff] %v639_v48  ;;  %644 = vst [vmem:[%s371_s12 + $0x18] sm:$0xff] %v640_v49 }
 0x14d   : > { %935 = shalt.err (!%p932_p11)
}
 0x14e   : > { %s936_s0 = scalar_lea.hbm %s1276_s29, 512  ;;  %s940_s15 = scalar_lea.hbm %s1326_s7, 1024 }
 0x14f   : > { %p937_p0 = scmp.ne.s32.totalorder %s1276_s29, %s936_s0  ;;  %p941_p6 = scmp.lt.s32.totalorder %s1276_s29, %s1326_s7 }
 0x150   : > { %p942_p13 = scmp.lt.s32.totalorder %s940_s15, %s936_s0 }
 0x151   : > { %p938_p4 = pnand %p937_p0, %p1342_p7 }
 0x152   : > { %p943_p2 = por %p942_p13, %p941_p6 }
 0x153   : > { %p939_p8 = pneg %p938_p4 }
 0x155   : > { %p944_p12 = pnand %p943_p2, %p939_p8 }
 0x157   : > { %947 = shalt.err (!%p944_p12)
}
 0x158   : > { %s1003_s12 = smov 128   ;;  %s1004_s20 = smov 256  }
 0x159   : > { %s1005_s18 = smov 8  }
 0x15a   : > { %805 = dma.vmem_to_hbm [thread:$0]  (%p1342_p7), %s1271_s21, 512, %s1276_s29, %s646_s28, %s1003_s12, %s1004_s20, %s1005_s18  }
 0x15b PF: > { %s673_s11 = sand.u32 1, %s978_s24   ;;  %p1343_p10 = scmp.ne.s32.totalorder %s1336_s14, 0 }
 0x15c   : > { %p1344_p1 = scmp.ge.s32.totalorder %s990_s27, 2  ;;  %s674_s22 = scalar_lea.sflag [#allocation4], %s673_s11 }
 0x15e   : > { %p815_p3 = pnand %p1344_p1, %p1343_p10 }
 0x160   : > { %p816_p5 = pneg %p815_p3 }
 0x162   : > { %973 = dma.done.wait (%p816_p5), %s674_s22, 512  }
 0x163   : > { %975 = vsyncadd (%p816_p5), %s674_s22, 4294966784  ;;  %s1345_s16 = sld [smem:[#allocation11_spill]]  ;;  %p23_p9 = scmp.ge.s32.totalorder %s1071_s30, 4  }
 0x164   : > { %s1346_s26 = sld [smem:[#allocation12_spill]]  ;;  %s1347_s24 = smov %s982_s25 }
 0x165   : > { %s1349_s27 = smov %s1071_s30  ;;  %25 = sbr.rel (!%p23_p9) target bundleno = 9 (0x9), region = 115 }
 0x169   : > { %s1348_s25 = smov %s1345_s16 }
 0x16a   :  { %679 = vsyncpa [#allocation3], 1 }
 0x16b   :  { %681 = vsyncpa [#allocation3 + $0x1], 1 }
 0x16c   :  { %682 = vsyncpa [#allocation6], 1 }
 0x16d   :  { %684 = vsyncpa [#allocation6 + $0x1], 1 }
 0x16e   :  { %685 = vsyncpa [#allocation4], 1 }
 0x16f   :  { %687 = vsyncpa [#allocation4 + $0x1], 1 }

</bundles_post_ra>
